<compile_context>
chip_gen: v7x
topology: tpu7x:2x2x1
jax: 0.10.0
libtpu: 0.0.40
codegen_flags: <defaults>
</compile_context>

<pallas_src>
import functools

import jax
import jax.numpy as jnp
from jax.experimental import pallas as pl
from jax.experimental.pallas import tpu as pltpu


LEAKY_SLOPE = 0.01      # nn.LeakyReLU() default
BN_EPS = 1e-5           # nn.BatchNorm1d default


def _round_up(n, m):
    return ((n + m - 1) // m) * m


def _pad128(n):
    return _round_up(n, 128)


# ----------------------------------------------------------------------------
# Fused kernel: whole AE forward for one [TM, n_features] batch tile.
# bias_layout is a static tuple of (offset, width) into the bias slab.
# ----------------------------------------------------------------------------
def _ae_fused_kernel(bias_layout, x_ref,
                     w0, w1, w2, w3, w4, w5, w6, w7,
                     b_ref, o_ref):
    ws = (w0, w1, w2, w3, w4, w5, w6, w7)

    def lin(h, li):
        off, width = bias_layout[li]
        acc = jnp.dot(h.astype(jnp.bfloat16), ws[li][...],
                      preferred_element_type=jnp.float32)
        return acc + b_ref[:, off:off + width]          # f32 bias (broadcast)

    def lrelu(h):
        return jnp.where(h >= 0.0, h, jnp.float32(LEAKY_SLOPE) * h)

    # Dropout layers are identity at inference; BN is pre-folded into weights.
    h = x_ref[...]
    for li in range(7):                                  # enc1..enc4, dec1..dec3
        h = lrelu(lin(h, li))
    o_ref[...] = jnp.maximum(lin(h, 7), 0.0).astype(o_ref.dtype)   # dec4 + ReLU


# ----------------------------------------------------------------------------
# Wrapper: tile the batch axis, keep weights/biases resident, call the kernel.
# ----------------------------------------------------------------------------
def ae_dropout_bn_forward(x, ws, bias_slab):
    B, F = x.shape
    F_out = ws[-1].shape[1]

    # Batch tiling: up to 512 rows per tile, >= 2 grid steps when the batch
    # allows so dimension_semantics=("parallel",) can use both v7x TCs; on
    # v5e/v6e the grid is a short serial loop (per-step overhead negligible).
    M8 = _round_up(B, 8)
    if M8 <= 8:
        TM = M8
    else:
        TM = min(512, _round_up(pl.cdiv(M8, 2), 8))
    M_p = _round_up(M8, TM)
    grid = (M_p // TM,)

    x = x.astype(jnp.float32)
    x_in = x if M_p == B else jnp.zeros((M_p, F), jnp.float32).at[:B].set(x)

    x_spec = pl.BlockSpec((TM, F), lambda i: (i, 0))
    o_spec = pl.BlockSpec((TM, F_out), lambda i: (i, 0))

    def const_spec(arr):
        # Full-array block, constant block index -> stays resident across tiles.
        return pl.BlockSpec(arr.shape, lambda i: (0,) * arr.ndim)

    # Static bias-slab layout derived from the (static) weight shapes.
    widths = [w.shape[1] for w in ws]
    offs, off = [], 0
    for wd in widths:
        offs.append(off)
        off += wd
    bias_layout = tuple((offs[i], widths[i]) for i in range(len(ws)))

    flops = 2 * M_p * sum(w.shape[0] * w.shape[1] for w in ws)
    bytes_accessed = (x_in.size * 4 + M_p * F_out * 4 + bias_slab.size * 4
                      + sum(w.size * 2 for w in ws))
    cost = pl.CostEstimate(flops=flops, transcendentals=0,
                           bytes_accessed=int(bytes_accessed))

    kernel = functools.partial(_ae_fused_kernel, bias_layout)

    out_p = pl.pallas_call(
        kernel,
        out_shape=jax.ShapeDtypeStruct((M_p, F_out), jnp.float32),
        grid=grid,
        in_specs=[x_spec] + [const_spec(w) for w in ws] + [const_spec(bias_slab)],
        out_specs=o_spec,
        compiler_params=pltpu.CompilerParams(
            dimension_semantics=("parallel",)),
        cost_estimate=cost,
    )(x_in, *ws, bias_slab)

    return out_p if M_p == B else out_p[:B]


# ----------------------------------------------------------------------------
# Parameter construction (PyTorch layouts).
# ----------------------------------------------------------------------------
def init_params(key, n_features, z_dim):
    enc_dims = [n_features, 200, 100, 50, z_dim]
    dec_dims = [z_dim, 50, 100, 200, n_features]
    params = {"enc": [], "dec": []}
    keys = jax.random.split(key, 64)
    ki = 0

    def nxt():
        nonlocal ki
        k = keys[ki]
        ki += 1
        return k

    s = 0.05
    for li in range(4):
        fin, fout = enc_dims[li], enc_dims[li + 1]
        w = s * jax.random.normal(nxt(), (fout, fin), jnp.float32)   # torch [out, in]
        b = s * jax.random.normal(nxt(), (fout,), jnp.float32)
        params["enc"].append((w, b))
    for li in range(4):
        fin, fout = dec_dims[li], dec_dims[li + 1]
        w = s * jax.random.normal(nxt(), (fout, fin), jnp.float32)
        b = s * jax.random.normal(nxt(), (fout,), jnp.float32)
        gamma = 1.0 + 0.1 * jax.random.normal(nxt(), (fout,), jnp.float32)
        beta = 0.1 * jax.random.normal(nxt(), (fout,), jnp.float32)
        mean = 0.1 * jax.random.normal(nxt(), (fout,), jnp.float32)
        var = 0.5 + jnp.abs(jax.random.normal(nxt(), (fout,), jnp.float32))
        params["dec"].append((w, b, gamma, beta, mean, var))
    return params


# ----------------------------------------------------------------------------
# Pack: fold eval-mode BN into Linear weights/biases, transpose to [in, out],
# zero-pad interior feature dims to 128, cast weights to bf16, concat biases.
# ----------------------------------------------------------------------------
def pack_params(params, n_features, z_dim):
    layers = []
    for (w, b) in params["enc"]:
        layers.append((w.T.astype(jnp.float32), b.astype(jnp.float32)))

    pending_scale = pending_shift = None
    for li, (w, b, gamma, beta, mean, var) in enumerate(params["dec"]):
        wT = w.T.astype(jnp.float32)                      # [in, out]
        bb = b.astype(jnp.float32)
        if pending_scale is not None:                     # fold previous BN (input side)
            bb = bb + pending_shift @ wT                  # uses un-scaled wT
            wT = pending_scale[:, None] * wT
        scale = gamma / jnp.sqrt(var + BN_EPS)
        shift = beta - mean * scale
        if li < 3:
            # Linear -> LeakyReLU -> BN: fold this BN into the NEXT layer.
            pending_scale, pending_shift = scale, shift
        else:
            # Last layer: Linear -> BN -> ReLU: fold BN into this layer's output side.
            wT = wT * scale[None, :]
            bb = bb * scale + shift
        layers.append((wT, bb))

    true_dims = [n_features, 200, 100, 50, z_dim, 50, 100, 200, n_features]
    pad_dims = ([true_dims[0]]
                + [_pad128(d) for d in true_dims[1:-1]]
                + [true_dims[-1]])

    ws, bias_segs = [], []
    for li, (wT, bb) in enumerate(layers):
        kp, np_ = pad_dims[li], pad_dims[li + 1]
        k, n = wT.shape
        wp = jnp.zeros((kp, np_), jnp.float32).at[:k, :n].set(wT)
        ws.append(wp.astype(jnp.bfloat16))
        bias_segs.append(jnp.zeros((np_,), jnp.float32).at[:n].set(bb))
    bias_slab = jnp.concatenate(bias_segs)[None, :]       # (1, sum N_p), f32
    return ws, bias_slab


# ----------------------------------------------------------------------------
# References.
# ----------------------------------------------------------------------------
def reference_forward_packed(x, ws, bias_slab):
    """Pure-JAX replica of the kernel math (same packed/folded/bf16 weights)."""
    widths = [w.shape[1] for w in ws]
    offs, off = [], 0
    for wd in widths:
        offs.append(off)
        off += wd
    h = x.astype(jnp.float32)
    for li in range(8):
        b = bias_slab[0, offs[li]:offs[li] + widths[li]]
        h = jnp.dot(h.astype(jnp.bfloat16), ws[li],
                    preferred_element_type=jnp.float32) + b
        if li < 7:
            h = jnp.where(h >= 0.0, h, LEAKY_SLOPE * h)
        else:
            h = jnp.maximum(h, 0.0)
    return h


def reference_forward_f32(x, params):
    """PyTorch-faithful eval-mode forward in full f32 (no folding, no bf16)."""
    def lrelu(h):
        return jnp.where(h >= 0.0, h, LEAKY_SLOPE * h)

    h = x.astype(jnp.float32)
    for (w, b) in params["enc"]:
        h = lrelu(jnp.dot(h, w.T, precision=jax.lax.Precision.HIGHEST) + b)
    for li, (w, b, gamma, beta, mean, var) in enumerate(params["dec"]):
        scale = gamma / jnp.sqrt(var + BN_EPS)
        shift = beta - mean * scale
        h = jnp.dot(h, w.T, precision=jax.lax.Precision.HIGHEST) + b
        if li < 3:
            h = lrelu(h) * scale + shift
        else:
            h = jnp.maximum(h * scale + shift, 0.0)
    return h


if __name__ == "__main__":
    B, N_FEATURES, Z_DIM = 2, 64, 8

    key = jax.random.PRNGKey(0)
    k_x, k_p = jax.random.split(key)
    x = jax.random.normal(k_x, (B, N_FEATURES), jnp.float32)

    raw_params = init_params(k_p, N_FEATURES, Z_DIM)
    ws, bias_slab = pack_params(raw_params, N_FEATURES, Z_DIM)

    fwd = jax.jit(ae_dropout_bn_forward)
    out = jax.block_until_ready(fwd(x, ws, bias_slab))

    assert out.shape == (B, N_FEATURES), out.shape
    assert out.dtype == jnp.float32
    assert bool(jnp.all(jnp.isfinite(out)))
    assert bool(jnp.all(out >= 0.0))            # final ReLU

    # Tight check: identical math (folded BN, bf16 matmul operands) in pure JAX.
    ref_packed = reference_forward_packed(x, ws, bias_slab)
    assert bool(jnp.allclose(out, ref_packed, rtol=2e-3, atol=2e-3)), (
        float(jnp.max(jnp.abs(out - ref_packed))))

    # Loose check: PyTorch-faithful f32 forward (validates the BN-fold algebra).
    ref_f32 = reference_forward_f32(x, raw_params)
    assert bool(jnp.allclose(out, ref_f32, rtol=2e-2, atol=2e-2)), (
        float(jnp.max(jnp.abs(out - ref_f32))))

    print("KERNEL_OK")
</pallas_src>

<mosaic_0001>
module attributes {stable_mosaic.version = 11 : i64} {
  func.func @_ae_fused_kernel(%arg0: i32, %arg1: memref<8x64xf32, #tpu.memory_space<vmem>>, %arg2: memref<64x256xbf16, #tpu.memory_space<vmem>>, %arg3: memref<256x128xbf16, #tpu.memory_space<vmem>>, %arg4: memref<128x128xbf16, #tpu.memory_space<vmem>>, %arg5: memref<128x128xbf16, #tpu.memory_space<vmem>>, %arg6: memref<128x128xbf16, #tpu.memory_space<vmem>>, %arg7: memref<128x128xbf16, #tpu.memory_space<vmem>>, %arg8: memref<128x256xbf16, #tpu.memory_space<vmem>>, %arg9: memref<256x64xbf16, #tpu.memory_space<vmem>>, %arg10: memref<1x1216xf32, #tpu.memory_space<vmem>>, %arg11: memref<8x64xf32, #tpu.memory_space<vmem>>) attributes {dimension_semantics = [#tpu.dimension_semantics<parallel>], iteration_bounds = array<i64: 1>, scalar_prefetch = 0 : i64, scratch_operands = 0 : i64, tpu.core_type = #tpu.core_type<tc>, window_params = [{transform_indices = @transform_0, window_bounds = array<i64: 8, 64>}, {pipeline_mode = #tpu.pipeline_mode<synchronous>, transform_indices = @transform_1, window_bounds = array<i64: 64, 256>}, {pipeline_mode = #tpu.pipeline_mode<synchronous>, transform_indices = @transform_2, window_bounds = array<i64: 256, 128>}, {pipeline_mode = #tpu.pipeline_mode<synchronous>, transform_indices = @transform_3, window_bounds = array<i64: 128, 128>}, {pipeline_mode = #tpu.pipeline_mode<synchronous>, transform_indices = @transform_4, window_bounds = array<i64: 128, 128>}, {pipeline_mode = #tpu.pipeline_mode<synchronous>, transform_indices = @transform_5, window_bounds = array<i64: 128, 128>}, {pipeline_mode = #tpu.pipeline_mode<synchronous>, transform_indices = @transform_6, window_bounds = array<i64: 128, 128>}, {pipeline_mode = #tpu.pipeline_mode<synchronous>, transform_indices = @transform_7, window_bounds = array<i64: 128, 256>}, {pipeline_mode = #tpu.pipeline_mode<synchronous>, transform_indices = @transform_8, window_bounds = array<i64: 256, 64>}, {pipeline_mode = #tpu.pipeline_mode<synchronous>, transform_indices = @transform_9, window_bounds = array<i64: 1, 1216>}, {transform_indices = @transform_10, window_bounds = array<i64: 8, 64>}]} {
    %c0 = arith.constant 0 : index
    %c0_0 = arith.constant 0 : index
    %0 = vector.load %arg1[%c0, %c0_0] : memref<8x64xf32, #tpu.memory_space<vmem>>, vector<8x64xf32>
    %1 = arith.truncf %0 : vector<8x64xf32> to vector<8x64xbf16>
    %c0_1 = arith.constant 0 : index
    %c0_2 = arith.constant 0 : index
    %2 = vector.load %arg2[%c0_1, %c0_2] : memref<64x256xbf16, #tpu.memory_space<vmem>>, vector<64x256xbf16>
    %cst = arith.constant dense<0.000000e+00> : vector<8x256xf32>
    %3 = tpu.matmul %1, %2, %cst {dimension_numbers = #tpu.dot_dimension_numbers<[1], [0], [0], [1], [0, 0, 1, 1], [], []>} : vector<8x64xbf16>, vector<64x256xbf16>, vector<8x256xf32> -> vector<8x256xf32>
    %c0_3 = arith.constant 0 : index
    %c0_4 = arith.constant 0 : index
    %4 = vector.load %arg10[%c0_3, %c0_4] : memref<1x1216xf32, #tpu.memory_space<vmem>>, vector<1x256xf32>
    %5 = vector.broadcast %4 : vector<1x256xf32> to vector<8x256xf32>
    %6 = arith.addf %3, %5 : vector<8x256xf32>
    %cst_5 = arith.constant 0.000000e+00 : f32
    %7 = vector.broadcast %cst_5 : f32 to vector<8x256xf32>
    %8 = arith.cmpf oge, %6, %7 : vector<8x256xf32>
    %cst_6 = arith.constant 0.00999999977 : f32
    %9 = vector.broadcast %cst_6 : f32 to vector<8x256xf32>
    %10 = arith.mulf %9, %6 : vector<8x256xf32>
    %11 = arith.select %8, %6, %10 : vector<8x256xi1>, vector<8x256xf32>
    %12 = arith.truncf %11 : vector<8x256xf32> to vector<8x256xbf16>
    %c0_7 = arith.constant 0 : index
    %c0_8 = arith.constant 0 : index
    %13 = vector.load %arg3[%c0_7, %c0_8] : memref<256x128xbf16, #tpu.memory_space<vmem>>, vector<256x128xbf16>
    %cst_9 = arith.constant dense<0.000000e+00> : vector<8x128xf32>
    %14 = tpu.matmul %12, %13, %cst_9 {dimension_numbers = #tpu.dot_dimension_numbers<[1], [0], [0], [1], [0, 0, 1, 1], [], []>} : vector<8x256xbf16>, vector<256x128xbf16>, vector<8x128xf32> -> vector<8x128xf32>
    %c0_10 = arith.constant 0 : index
    %c256 = arith.constant 256 : index
    %15 = vector.load %arg10[%c0_10, %c256] : memref<1x1216xf32, #tpu.memory_space<vmem>>, vector<1x128xf32>
    %16 = vector.broadcast %15 : vector<1x128xf32> to vector<8x128xf32>
    %17 = arith.addf %14, %16 : vector<8x128xf32>
    %cst_11 = arith.constant 0.000000e+00 : f32
    %18 = vector.broadcast %cst_11 : f32 to vector<8x128xf32>
    %19 = arith.cmpf oge, %17, %18 : vector<8x128xf32>
    %cst_12 = arith.constant 0.00999999977 : f32
    %20 = vector.broadcast %cst_12 : f32 to vector<8x128xf32>
    %21 = arith.mulf %20, %17 : vector<8x128xf32>
    %22 = arith.select %19, %17, %21 : vector<8x128xi1>, vector<8x128xf32>
    %23 = arith.truncf %22 : vector<8x128xf32> to vector<8x128xbf16>
    %c0_13 = arith.constant 0 : index
    %c0_14 = arith.constant 0 : index
    %24 = vector.load %arg4[%c0_13, %c0_14] : memref<128x128xbf16, #tpu.memory_space<vmem>>, vector<128x128xbf16>
    %cst_15 = arith.constant dense<0.000000e+00> : vector<8x128xf32>
    %25 = tpu.matmul %23, %24, %cst_15 {dimension_numbers = #tpu.dot_dimension_numbers<[1], [0], [0], [1], [0, 0, 1, 1], [], []>} : vector<8x128xbf16>, vector<128x128xbf16>, vector<8x128xf32> -> vector<8x128xf32>
    %c0_16 = arith.constant 0 : index
    %c384 = arith.constant 384 : index
    %26 = vector.load %arg10[%c0_16, %c384] : memref<1x1216xf32, #tpu.memory_space<vmem>>, vector<1x128xf32>
    %27 = vector.broadcast %26 : vector<1x128xf32> to vector<8x128xf32>
    %28 = arith.addf %25, %27 : vector<8x128xf32>
    %cst_17 = arith.constant 0.000000e+00 : f32
    %29 = vector.broadcast %cst_17 : f32 to vector<8x128xf32>
    %30 = arith.cmpf oge, %28, %29 : vector<8x128xf32>
    %cst_18 = arith.constant 0.00999999977 : f32
    %31 = vector.broadcast %cst_18 : f32 to vector<8x128xf32>
    %32 = arith.mulf %31, %28 : vector<8x128xf32>
    %33 = arith.select %30, %28, %32 : vector<8x128xi1>, vector<8x128xf32>
    %34 = arith.truncf %33 : vector<8x128xf32> to vector<8x128xbf16>
    %c0_19 = arith.constant 0 : index
    %c0_20 = arith.constant 0 : index
    %35 = vector.load %arg5[%c0_19, %c0_20] : memref<128x128xbf16, #tpu.memory_space<vmem>>, vector<128x128xbf16>
    %cst_21 = arith.constant dense<0.000000e+00> : vector<8x128xf32>
    %36 = tpu.matmul %34, %35, %cst_21 {dimension_numbers = #tpu.dot_dimension_numbers<[1], [0], [0], [1], [0, 0, 1, 1], [], []>} : vector<8x128xbf16>, vector<128x128xbf16>, vector<8x128xf32> -> vector<8x128xf32>
    %c0_22 = arith.constant 0 : index
    %c512 = arith.constant 512 : index
    %37 = vector.load %arg10[%c0_22, %c512] : memref<1x1216xf32, #tpu.memory_space<vmem>>, vector<1x128xf32>
    %38 = vector.broadcast %37 : vector<1x128xf32> to vector<8x128xf32>
    %39 = arith.addf %36, %38 : vector<8x128xf32>
    %cst_23 = arith.constant 0.000000e+00 : f32
    %40 = vector.broadcast %cst_23 : f32 to vector<8x128xf32>
    %41 = arith.cmpf oge, %39, %40 : vector<8x128xf32>
    %cst_24 = arith.constant 0.00999999977 : f32
    %42 = vector.broadcast %cst_24 : f32 to vector<8x128xf32>
    %43 = arith.mulf %42, %39 : vector<8x128xf32>
    %44 = arith.select %41, %39, %43 : vector<8x128xi1>, vector<8x128xf32>
    %45 = arith.truncf %44 : vector<8x128xf32> to vector<8x128xbf16>
    %c0_25 = arith.constant 0 : index
    %c0_26 = arith.constant 0 : index
    %46 = vector.load %arg6[%c0_25, %c0_26] : memref<128x128xbf16, #tpu.memory_space<vmem>>, vector<128x128xbf16>
    %cst_27 = arith.constant dense<0.000000e+00> : vector<8x128xf32>
    %47 = tpu.matmul %45, %46, %cst_27 {dimension_numbers = #tpu.dot_dimension_numbers<[1], [0], [0], [1], [0, 0, 1, 1], [], []>} : vector<8x128xbf16>, vector<128x128xbf16>, vector<8x128xf32> -> vector<8x128xf32>
    %c0_28 = arith.constant 0 : index
    %c640 = arith.constant 640 : index
    %48 = vector.load %arg10[%c0_28, %c640] : memref<1x1216xf32, #tpu.memory_space<vmem>>, vector<1x128xf32>
    %49 = vector.broadcast %48 : vector<1x128xf32> to vector<8x128xf32>
    %50 = arith.addf %47, %49 : vector<8x128xf32>
    %cst_29 = arith.constant 0.000000e+00 : f32
    %51 = vector.broadcast %cst_29 : f32 to vector<8x128xf32>
    %52 = arith.cmpf oge, %50, %51 : vector<8x128xf32>
    %cst_30 = arith.constant 0.00999999977 : f32
    %53 = vector.broadcast %cst_30 : f32 to vector<8x128xf32>
    %54 = arith.mulf %53, %50 : vector<8x128xf32>
    %55 = arith.select %52, %50, %54 : vector<8x128xi1>, vector<8x128xf32>
    %56 = arith.truncf %55 : vector<8x128xf32> to vector<8x128xbf16>
    %c0_31 = arith.constant 0 : index
    %c0_32 = arith.constant 0 : index
    %57 = vector.load %arg7[%c0_31, %c0_32] : memref<128x128xbf16, #tpu.memory_space<vmem>>, vector<128x128xbf16>
    %cst_33 = arith.constant dense<0.000000e+00> : vector<8x128xf32>
    %58 = tpu.matmul %56, %57, %cst_33 {dimension_numbers = #tpu.dot_dimension_numbers<[1], [0], [0], [1], [0, 0, 1, 1], [], []>} : vector<8x128xbf16>, vector<128x128xbf16>, vector<8x128xf32> -> vector<8x128xf32>
    %c0_34 = arith.constant 0 : index
    %c768 = arith.constant 768 : index
    %59 = vector.load %arg10[%c0_34, %c768] : memref<1x1216xf32, #tpu.memory_space<vmem>>, vector<1x128xf32>
    %60 = vector.broadcast %59 : vector<1x128xf32> to vector<8x128xf32>
    %61 = arith.addf %58, %60 : vector<8x128xf32>
    %cst_35 = arith.constant 0.000000e+00 : f32
    %62 = vector.broadcast %cst_35 : f32 to vector<8x128xf32>
    %63 = arith.cmpf oge, %61, %62 : vector<8x128xf32>
    %cst_36 = arith.constant 0.00999999977 : f32
    %64 = vector.broadcast %cst_36 : f32 to vector<8x128xf32>
    %65 = arith.mulf %64, %61 : vector<8x128xf32>
    %66 = arith.select %63, %61, %65 : vector<8x128xi1>, vector<8x128xf32>
    %67 = arith.truncf %66 : vector<8x128xf32> to vector<8x128xbf16>
    %c0_37 = arith.constant 0 : index
    %c0_38 = arith.constant 0 : index
    %68 = vector.load %arg8[%c0_37, %c0_38] : memref<128x256xbf16, #tpu.memory_space<vmem>>, vector<128x256xbf16>
    %cst_39 = arith.constant dense<0.000000e+00> : vector<8x256xf32>
    %69 = tpu.matmul %67, %68, %cst_39 {dimension_numbers = #tpu.dot_dimension_numbers<[1], [0], [0], [1], [0, 0, 1, 1], [], []>} : vector<8x128xbf16>, vector<128x256xbf16>, vector<8x256xf32> -> vector<8x256xf32>
    %c0_40 = arith.constant 0 : index
    %c896 = arith.constant 896 : index
    %70 = vector.load %arg10[%c0_40, %c896] : memref<1x1216xf32, #tpu.memory_space<vmem>>, vector<1x256xf32>
    %71 = vector.broadcast %70 : vector<1x256xf32> to vector<8x256xf32>
    %72 = arith.addf %69, %71 : vector<8x256xf32>
    %cst_41 = arith.constant 0.000000e+00 : f32
    %73 = vector.broadcast %cst_41 : f32 to vector<8x256xf32>
    %74 = arith.cmpf oge, %72, %73 : vector<8x256xf32>
    %cst_42 = arith.constant 0.00999999977 : f32
    %75 = vector.broadcast %cst_42 : f32 to vector<8x256xf32>
    %76 = arith.mulf %75, %72 : vector<8x256xf32>
    %77 = arith.select %74, %72, %76 : vector<8x256xi1>, vector<8x256xf32>
    %78 = arith.truncf %77 : vector<8x256xf32> to vector<8x256xbf16>
    %c0_43 = arith.constant 0 : index
    %c0_44 = arith.constant 0 : index
    %79 = vector.load %arg9[%c0_43, %c0_44] : memref<256x64xbf16, #tpu.memory_space<vmem>>, vector<256x64xbf16>
    %cst_45 = arith.constant dense<0.000000e+00> : vector<8x64xf32>
    %80 = tpu.matmul %78, %79, %cst_45 {dimension_numbers = #tpu.dot_dimension_numbers<[1], [0], [0], [1], [0, 0, 1, 1], [], []>} : vector<8x256xbf16>, vector<256x64xbf16>, vector<8x64xf32> -> vector<8x64xf32>
    %c0_46 = arith.constant 0 : index
    %c1152 = arith.constant 1152 : index
    %81 = vector.load %arg10[%c0_46, %c1152] : memref<1x1216xf32, #tpu.memory_space<vmem>>, vector<1x64xf32>
    %82 = vector.broadcast %81 : vector<1x64xf32> to vector<8x64xf32>
    %83 = arith.addf %80, %82 : vector<8x64xf32>
    %cst_47 = arith.constant 0.000000e+00 : f32
    %84 = vector.broadcast %cst_47 : f32 to vector<8x64xf32>
    %85 = arith.maximumf %83, %84 : vector<8x64xf32>
    %c0_48 = arith.constant 0 : index
    %c0_49 = arith.constant 0 : index
    %86 = vector.load %arg11[%c0_48, %c0_49] : memref<8x64xf32, #tpu.memory_space<vmem>>, vector<8x64xf32>
    tpu.vector_store %arg11[%c0_48, %c0_49], %85 {strides = array<i32>} : memref<8x64xf32, #tpu.memory_space<vmem>>, vector<8x64xf32>,
    return
  }
  func.func @transform_0(%arg0: i32) -> (i32, i32) {
    %c0_i32 = arith.constant 0 : i32
    %c0_i32_0 = arith.constant 0 : i32
    return %arg0, %c0_i32 : i32, i32
  }
  func.func @transform_1(%arg0: i32) -> (i32, i32) {
    %c0_i32 = arith.constant 0 : i32
    %c0_i32_0 = arith.constant 0 : i32
    %c0_i32_1 = arith.constant 0 : i32
    return %c0_i32, %c0_i32_0 : i32, i32
  }
  func.func @transform_2(%arg0: i32) -> (i32, i32) {
    %c0_i32 = arith.constant 0 : i32
    %c0_i32_0 = arith.constant 0 : i32
    %c0_i32_1 = arith.constant 0 : i32
    return %c0_i32, %c0_i32_0 : i32, i32
  }
  func.func @transform_3(%arg0: i32) -> (i32, i32) {
    %c0_i32 = arith.constant 0 : i32
    %c0_i32_0 = arith.constant 0 : i32
    %c0_i32_1 = arith.constant 0 : i32
    return %c0_i32, %c0_i32_0 : i32, i32
  }
  func.func @transform_4(%arg0: i32) -> (i32, i32) {
    %c0_i32 = arith.constant 0 : i32
    %c0_i32_0 = arith.constant 0 : i32
    %c0_i32_1 = arith.constant 0 : i32
    return %c0_i32, %c0_i32_0 : i32, i32
  }
  func.func @transform_5(%arg0: i32) -> (i32, i32) {
    %c0_i32 = arith.constant 0 : i32
    %c0_i32_0 = arith.constant 0 : i32
    %c0_i32_1 = arith.constant 0 : i32
    return %c0_i32, %c0_i32_0 : i32, i32
  }
  func.func @transform_6(%arg0: i32) -> (i32, i32) {
    %c0_i32 = arith.constant 0 : i32
    %c0_i32_0 = arith.constant 0 : i32
    %c0_i32_1 = arith.constant 0 : i32
    return %c0_i32, %c0_i32_0 : i32, i32
  }
  func.func @transform_7(%arg0: i32) -> (i32, i32) {
    %c0_i32 = arith.constant 0 : i32
    %c0_i32_0 = arith.constant 0 : i32
    %c0_i32_1 = arith.constant 0 : i32
    return %c0_i32, %c0_i32_0 : i32, i32
  }
  func.func @transform_8(%arg0: i32) -> (i32, i32) {
    %c0_i32 = arith.constant 0 : i32
    %c0_i32_0 = arith.constant 0 : i32
    %c0_i32_1 = arith.constant 0 : i32
    return %c0_i32, %c0_i32_0 : i32, i32
  }
  func.func @transform_9(%arg0: i32) -> (i32, i32) {
    %c0_i32 = arith.constant 0 : i32
    %c0_i32_0 = arith.constant 0 : i32
    %c0_i32_1 = arith.constant 0 : i32
    return %c0_i32, %c0_i32_0 : i32, i32
  }
  func.func @transform_10(%arg0: i32) -> (i32, i32) {
    %c0_i32 = arith.constant 0 : i32
    %c0_i32_0 = arith.constant 0 : i32
    return %arg0, %c0_i32 : i32, i32
  }
}

</mosaic_0001>

<bundles_post_ra>
// kernel: ae_dropout_bn_forward.1
= control target key start
LH: loop header
LB: loop body
LE: loop exit
PB: predicated region body
PF: predicated region fallthrough
CT: control target
= control target key end

     0   :  { %15 = vsyncpa [#allocation3], 0  ;;  %s2041_s0 = inlined_call_operand.vmem [shape: f32[8,64], index: 0, kind: input, shape index: {}]   ;;  %s2042_s1 = inlined_call_operand.vmem [shape: bf16[64,256], index: 1, kind: input, shape index: {}]   ;;  %s2043_s2 = inlined_call_operand.vmem [shape: bf16[256,128], index: 2, kind: input, shape index: {}]   ;;  %s2044_s3 = inlined_call_operand.hbm [shape: bf16[128,128], index: 3, kind: input, shape index: {}]   ;;  %s2045_s4 = inlined_call_operand.hbm [shape: bf16[128,128], index: 4, kind: input, shape index: {}]   ;;  %s2046_s5 = inlined_call_operand.hbm [shape: bf16[128,128], index: 5, kind: input, shape index: {}]   ;;  %s2047_s6 = inlined_call_operand.hbm [shape: bf16[128,128], index: 6, kind: input, shape index: {}]   ;;  %s2048_s7 = inlined_call_operand.hbm [shape: bf16[128,256], index: 7, kind: input, shape index: {}]   ;;  %s2049_s8 = inlined_call_operand.vmem [shape: bf16[256,64], index: 8, kind: input, shape index: {}]   ;;  %s2050_s9 = inlined_call_operand.vmem [shape: f32[1,1216], index: 9, kind: input, shape index: {}]   ;;  %s2051_s10 = inlined_call_operand.vmem [shape: f32[8,64], index: 10, kind: output, shape index: {}]  }
   0x1   :  { %16 = vsyncpa [#allocation5], 0 }
   0x2   :  { %17 = vsyncpa [#allocation8], 0  ;;  %s1682_s13 = smov [#allocation4]   ;;  %s1683_s15 = smov [#allocation7]  }
   0x3   :  { %s41_s14 = sshll.u32 %s1682_s13, 4  ;;  %s65_s16 = sshll.u32 %s1683_s15, 4  ;;  %s42_s14 = int_to_ptr.vmem [resolvable:$true] %s41_s14  ;;  %s1749_s16 = int_to_ptr.vmem [resolvable:$true] %s65_s16 }
   0x4   :  { %s1566_s19 = scalar_lea.hbm %s2045_s4, 1024 }
   0x5   :  { %p1567_p0 = scmp.ne.s32.totalorder %s2045_s4, %s1566_s19  ;;  %p1570_p1 = scmp.lt.u32.totalorder %s1566_s19, %s2045_s4 }
   0x7   :  { %p1572_p2 = pnand %p1570_p1, %p1567_p0 }
   0x9   :  { %1575 = shalt.err (!%p1572_p2)
}
   0xa   :  { %s1576_s24 = scalar_lea.vmem %s42_s14, 1024  ;;  %p1581_p4 = scmp.lt.s32.totalorder %s42_s14, %s42_s14 }
   0xb   :  { %p1577_p3 = scmp.ne.s32.totalorder %s42_s14, %s1576_s24  ;;  %p1582_p5 = scmp.lt.s32.totalorder %s1576_s24, %s1576_s24 }
   0xd   :  { %p1583_p6 = por %p1582_p5, %p1581_p4 }
   0xf   :  { %p1584_p7 = pnand %p1583_p6, %p1577_p3 }
  0x11   :  { %1587 = shalt.err (!%p1584_p7)
}
  0x12   :  { %s1684_s25 = smov 64   ;;  %s1685_s26 = smov 4  }
  0x13   :  { %47 = dma.hbm_to_vmem [thread:$0]  %s2045_s4, 1024, %s42_s14, [#allocation5], %s1684_s25, %s1684_s25, %s1685_s26  }
  0x14   :  { %s1588_s11 = scalar_lea.hbm %s2047_s6, 1024 }
  0x15   :  { %p1589_p8 = scmp.ne.s32.totalorder %s2047_s6, %s1588_s11  ;;  %p1592_p9 = scmp.lt.u32.totalorder %s1588_s11, %s2047_s6 }
  0x17   :  { %p1594_p10 = pnand %p1592_p9, %p1589_p8 }
  0x19   :  { %1597 = shalt.err (!%p1594_p10)
}
  0x1a   :  { %s1598_s18 = scalar_lea.vmem %s1749_s16, 1024  ;;  %p1603_p12 = scmp.lt.s32.totalorder %s1749_s16, %s1749_s16 }
  0x1b   :  { %p1599_p11 = scmp.ne.s32.totalorder %s1749_s16, %s1598_s18  ;;  %p1604_p13 = scmp.lt.s32.totalorder %s1598_s18, %s1598_s18 }
  0x1d   :  { %p1605_p0 = por %p1604_p13, %p1603_p12 }
  0x1f   :  { %p1606_p1 = pnand %p1605_p0, %p1599_p11 }
  0x21   :  { %1609 = shalt.err (!%p1606_p1)
}
  0x22   :  { %71 = dma.hbm_to_vmem [thread:$0]  %s2047_s6, 1024, %s1749_s16, [#allocation8], %s1684_s25, %s1684_s25, %s1685_s26  }
  0x23   :  { %s1686_s19 = smov [#allocation2]   ;;  %s1687_s21 = smov [#allocation6]  }
  0x24   :  { %s29_s20 = sshll.u32 %s1686_s19, 4  ;;  %s53_s22 = sshll.u32 %s1687_s21, 4  ;;  %s30_s20 = int_to_ptr.vmem [resolvable:$true] %s29_s20  ;;  %s1786_s22 = int_to_ptr.vmem [resolvable:$true] %s53_s22 }
  0x25   :  { %s1610_s27 = scalar_lea.hbm %s2044_s3, 1024 }
  0x26   :  { %p1611_p2 = scmp.ne.s32.totalorder %s2044_s3, %s1610_s27  ;;  %p1614_p3 = scmp.lt.u32.totalorder %s1610_s27, %s2044_s3 }
  0x28   :  { %p1616_p4 = pnand %p1614_p3, %p1611_p2 }
  0x2a   :  { %1619 = shalt.err (!%p1616_p4)
}
  0x2b   :  { %s1620_s6 = scalar_lea.vmem %s30_s20, 1024  ;;  %p1625_p6 = scmp.lt.s32.totalorder %s30_s20, %s30_s20 }
  0x2c   :  { %p1621_p5 = scmp.ne.s32.totalorder %s30_s20, %s1620_s6  ;;  %p1626_p7 = scmp.lt.s32.totalorder %s1620_s6, %s1620_s6 }
  0x2e   :  { %p1627_p8 = por %p1626_p7, %p1625_p6 }
  0x30   :  { %p1628_p9 = pnand %p1627_p8, %p1621_p5 }
  0x32   :  { %1631 = shalt.err (!%p1628_p9)
}
  0x33   :  { %35 = dma.hbm_to_vmem [thread:$0]  %s2044_s3, 1024, %s30_s20, [#allocation3], %s1684_s25, %s1684_s25, %s1685_s26  }
  0x34   :  { %s1632_s17 = scalar_lea.hbm %s2046_s5, 1024 }
  0x35   :  { %p1633_p10 = scmp.ne.s32.totalorder %s2046_s5, %s1632_s17  ;;  %p1636_p11 = scmp.lt.u32.totalorder %s1632_s17, %s2046_s5 }
  0x37   :  { %p1638_p12 = pnand %p1636_p11, %p1633_p10 }
  0x39   :  { %1641 = shalt.err (!%p1638_p12)
}
  0x3a   :  { %s1642_s21 = scalar_lea.vmem %s1786_s22, 1024  ;;  %p1647_p0 = scmp.lt.s32.totalorder %s1786_s22, %s1786_s22 }
  0x3b   :  { %p1643_p13 = scmp.ne.s32.totalorder %s1786_s22, %s1642_s21  ;;  %p1648_p1 = scmp.lt.s32.totalorder %s1642_s21, %s1642_s21 }
  0x3d   :  { %p1649_p2 = por %p1648_p1, %p1647_p0 }
  0x3f   :  { %p1650_p3 = pnand %p1649_p2, %p1643_p13 }
  0x41   :  { %1653 = shalt.err (!%p1650_p3)
}
  0x42   :  { %59 = dma.hbm_to_vmem [thread:$0]  %s2046_s5, 1024, %s1786_s22, [#allocation5], %s1684_s25, %s1684_s25, %s1685_s26  }
  0x43   :  { %s1688_s23 = smov [#allocation9]   ;;  %s1654_s29 = scalar_lea.hbm %s2048_s7, 2048 }
  0x44   :  { %s77_s24 = sshll.u32 %s1688_s23, 4  ;;  %p1655_p4 = scmp.ne.s32.totalorder %s2048_s7, %s1654_s29  ;;  %s78_s24 = int_to_ptr.vmem [resolvable:$true] %s77_s24 }
  0x45   :  { %p1658_p5 = scmp.lt.u32.totalorder %s1654_s29, %s2048_s7 }
  0x47   :  { %p1660_p6 = pnand %p1658_p5, %p1655_p4 }
  0x49   :  { %1663 = shalt.err (!%p1660_p6)
}
  0x4a   :  { %s1664_s12 = scalar_lea.vmem %s78_s24, 2048  ;;  %p1669_p8 = scmp.lt.s32.totalorder %s78_s24, %s78_s24 }
  0x4b   :  { %p1665_p7 = scmp.ne.s32.totalorder %s78_s24, %s1664_s12  ;;  %p1670_p9 = scmp.lt.s32.totalorder %s1664_s12, %s1664_s12 }
  0x4d   :  { %p1671_p10 = por %p1670_p9, %p1669_p8 }
  0x4f   :  { %p1672_p11 = pnand %p1671_p10, %p1665_p7 }
  0x51   :  { %1675 = shalt.err (!%p1672_p11)
}
  0x52   :  { %s1689_s5 = smov 128   ;;  %s1690_s25 = smov 8  }
  0x53   :  { %83 = dma.hbm_to_vmem [thread:$0]  %s2048_s7, 2048, %s78_s24, [#allocation8], %s1689_s5, %s1689_s5, %s1690_s25  }
  0x54   :  { %1676 = dma.done.wait [#allocation3], 1024  }
  0x55   :  { %1677 = vsyncadd [#allocation3], 4294966272 }
  0x56   :  { %1678 = dma.done.wait [#allocation5], 2048  }
  0x57   :  { %1679 = vsyncadd [#allocation5], 4294965248 }
  0x58   :  { %1680 = dma.done.wait [#allocation8], 3072  }
  0x59   :  { %1681 = vsyncadd [#allocation8], 4294964224  ;;  %v1691_v0 = vmov 0   ;;  %v1466_v1 = vld [vmem:[%s2042_s1 + $0x4] ss:$8 sps:$4 sm:$0xff]   ;;  %v1482_v13 = vld [vmem:[%s2043_s2 + $0x50] sm:$0xff]   ;;  %v116_v33 = vlaneseq }
  0x5a   :  { %202 = vmatprep.mubr.bf16.mxu0 %v1691_v0  ;;  %v1468_v2 = vld [vmem:[%s2042_s1] ss:$8 sps:$4 sm:$0xff]   ;;  %170 = vmatprep.subr.bf16.mxu0 %v1466_v1  ;;  %v1469_v3 = vld [vmem:[%s2042_s1 + $0x14] ss:$8 sps:$4 sm:$0xff]   ;;  %v1471_v4 = vld [vmem:[%s2042_s1 + $0x10] ss:$8 sps:$4 sm:$0xff]  }
  0x5b   :  { %171 = vmatpush1.bf16.msra.mxu0 %v1468_v2  ;;  %v1472_v5 = vld [vmem:[%s2042_s1 + $0x24] ss:$8 sps:$4 sm:$0xff]   ;;  %v1474_v6 = vld [vmem:[%s2042_s1 + $0x20] ss:$8 sps:$4 sm:$0xff]   ;;  %v1475_v7 = vld [vmem:[%s2042_s1 + $0x34] ss:$8 sps:$4 sm:$0xff]  }
  0x5c   :  { %172 = vmatprep.subr.bf16.mxu0 %v1469_v3  ;;  %v1478_v8 = vld [vmem:[%s2043_s2 + $0x40] sm:$0xff]   ;;  %v1480_v10 = vld [vmem:[%s2043_s2 + $0x48] sm:$0xff]   ;;  %v1477_v11 = vld [vmem:[%s2042_s1 + $0x30] ss:$8 sps:$4 sm:$0xff]   ;;  %vm166_vm0 = vcmask 523264   ;;  %v1692_v28 = vmov 0.0  }
  0x5d   :  { %v1479_v9 = vld [vmem:[%s2043_s2] sm:$0xff]   ;;  %1294 = vmatprep.subr.bf16.mxu1 %v1478_v8  ;;  %v1481_v12 = vld [vmem:[%s2043_s2 + $0x8] sm:$0xff]   ;;  %v1483_v15 = vld [vmem:[%s2043_s2 + $0x10] sm:$0xff]   ;;  %v1919_v34 = vshrl.u32 %v116_v33, 7  ;;  %vm1693_vm3 = vmmov 0  }
  0x5e   :  { %1295 = vmatpush3.bf16.msra.mxu1 %v1479_v9  ;;  %v104_v14 = vld [vmem:[%s2041_s0] sm:$0xff]  ;;  %v1484_v17 = vld [vmem:[%s2043_s2 + $0x58] sm:$0xff]   ;;  %v1488_v21 = vld [vmem:[%s2043_s2 + $0x68] sm:$0xff]  }
  0x5f   :  { %173 = vmatpush1.bf16.msra.mxu0 %v1471_v4  ;;  %1296 = vmatprep.subr.bf16.mxu1 %v1480_v10  ;;  %v105_v16 = vpack.c.bf16 %v104_v14, %v104_v14  ;;  %v1485_v18 = vld [vmem:[%s2043_s2 + $0x18] sm:$0xff]   ;;  %v1486_v19 = vld [vmem:[%s2043_s2 + $0x60] sm:$0xff]   ;;  %v1489_v22 = vld [vmem:[%s2043_s2 + $0x28] sm:$0xff]   ;;  %v118_v35 = vsub.s32 0, %v1919_v34  ;;  %v122_v37 = vsub.s32 1, %v1919_v34 }
  0x60   :  { %174 = vmatprep.subr.bf16.mxu0 %v1472_v5  ;;  %v1487_v20 = vld [vmem:[%s2043_s2 + $0x20] sm:$0xff]   ;;  %v1490_v23 = vld [vmem:[%s2043_s2 + $0x70] sm:$0xff]   ;;  %v1492_v25 = vld [vmem:[%s2043_s2 + $0x78] sm:$0xff]  }
  0x61   :  { %v1491_v24 = vld [vmem:[%s2043_s2 + $0x30] sm:$0xff]   ;;  %v1493_v26 = vld [vmem:[%s2043_s2 + $0x38] sm:$0xff]   ;;  %v1494_v27 = vld [vmem:[#allocation2] sm:$0xff]  }
  0x62   :  { %1297 = vmatpush3.bf16.msra.mxu1 %v1481_v12  ;;  %v1495_v29 = vld [vmem:[#allocation2 + $0x8] sm:$0xff]   ;;  %v1496_v30 = vld [vmem:[#allocation2 + $0x10] sm:$0xff]   ;;  %v1497_v31 = vld [vmem:[#allocation2 + $0x18] sm:$0xff]  }
  0x63   :  { %175 = vmatpush1.bf16.msra.mxu0 %v1474_v6  ;;  %1298 = vmatprep.subr.bf16.mxu1 %v1482_v13  ;;  %v1498_v32 = vld [vmem:[#allocation2 + $0x20] sm:$0xff]   ;;  %v1499_v52 = vld [vmem:[#allocation2 + $0x28] sm:$0xff]   ;;  %v1500_v53 = vld [vmem:[#allocation2 + $0x30] sm:$0xff]  }
  0x64   :  { %176 = vmatprep.subr.bf16.mxu0 %v1475_v7  ;;  %v114_v36 = vld [vmem:[%s2050_s9] sm:$0x3]  ;;  %v1501_v54 = vld [vmem:[#allocation2 + $0x38] sm:$0xff]   ;;  %v1503_v56 = vld [vmem:[#allocation4 + $0x8] sm:$0xff]  }
  0x65   :  { %v119_v38 = vrot.slane %v114_v36, %v118_v35  ;;  %v123_v39 = vrot.slane %v114_v36, %v122_v37  ;;  %v1502_v55 = vld [vmem:[#allocation4] sm:$0xff]   ;;  %v1504_v57 = vld [vmem:[#allocation4 + $0x10] sm:$0xff]   ;;  %v1505_v58 = vld [vmem:[#allocation4 + $0x18] sm:$0xff]  }
  0x66   :  { %1299 = vmatpush3.bf16.msra.mxu1 %v1483_v15  ;;  %v1506_v59 = vld [vmem:[#allocation4 + $0x20] sm:$0xff]   ;;  %v1507_v60 = vld [vmem:[#allocation4 + $0x28] sm:$0xff]   ;;  %v1508_v8 = vld [vmem:[#allocation4 + $0x30] sm:$0xff]  }
  0x67   :  { %177 = vmatpush1.bf16.msra.mxu0 %v1477_v11  ;;  %1300 = vmatprep.subr.bf16.mxu1 %v1484_v17  ;;  %v1208_v62 = vld [vmem:[%s2050_s9 + $0x2] ss:$0 sm:$0xff]  ;;  %v1509_v9 = vld [vmem:[#allocation4 + $0x38] sm:$0xff]   ;;  %v1511_v11 = vld [vmem:[#allocation6 + $0x8] sm:$0xff]  }
  0x68   :  { %1374 = vmatprep.subr.bf16.mxu0 %v1692_v28  ;;  %v1510_v10 = vld [vmem:[#allocation6] sm:$0xff]   ;;  %v1512_v12 = vld [vmem:[#allocation6 + $0x10] sm:$0xff]   ;;  %v1513_v13 = vld [vmem:[#allocation6 + $0x18] sm:$0xff]  }
  0x69   :  { %v1514_v14 = vld [vmem:[#allocation6 + $0x20] sm:$0xff]   ;;  %v1515_v15 = vld [vmem:[#allocation6 + $0x28] sm:$0xff]  }
  0x6a   :  { %1207 = vmatmul.mubr.msk.bf16.vlgmr.msra.gmra.mrb[0].mxu0 %vm166_vm0, %v105_v16  ;;  %1301 = vmatpush3.bf16.msra.mxu1 %v1485_v18  ;;  %v1225_v16 = vld [vmem:[%s2050_s9 + $0x3] ss:$0 sm:$0xff]  ;;  %v1523_v33 = vld [vmem:[#allocation7 + $0x28] sm:$0xff]   ;;  %v1234_v36 = vld [vmem:[%s2050_s9 + $0x4] ss:$0 sm:$0xff] }
  0x6b   :  { %1302 = vmatprep.subr.bf16.mxu1 %v1486_v19  ;;  %1375 = vmatpush3.bf16.msra.mxu0 %v1494_v27  ;;  %v1518_v27 = vld [vmem:[#allocation7] sm:$0xff]   ;;  %v1277_v34 = vld [vmem:[%s2050_s9 + $0x9] ss:$0 sm:$0xff] }
  0x6c   :  { %1376 = vmatprep.subr.bf16.mxu0 %v1692_v28  ;;  %1390 = vmatprep.mubr.msk.bf16.mxu0 %vm1693_vm3, %v1692_v28 }
  0x6e   :  { %1303 = vmatpush3.bf16.msra.mxu1 %v1487_v20 }
  0x6f   :  { %1304 = vmatprep.subr.bf16.mxu1 %v1488_v21  ;;  %1377 = vmatpush3.bf16.msra.mxu0 %v1495_v29  ;;  %v1519_v29 = vld [vmem:[#allocation7 + $0x8] sm:$0xff]  }
  0x70   :  { %1378 = vmatprep.subr.bf16.mxu0 %v1692_v28 }
  0x72   :  { %1305 = vmatpush3.bf16.msra.mxu1 %v1489_v22 }
  0x73   :  { %1306 = vmatprep.subr.bf16.mxu1 %v1490_v23  ;;  %1379 = vmatpush3.bf16.msra.mxu0 %v1496_v30  ;;  %v1520_v30 = vld [vmem:[#allocation7 + $0x10] sm:$0xff]  }
  0x74   :  { %1380 = vmatprep.subr.bf16.mxu0 %v1692_v28 }
  0x76   :  { %1307 = vmatpush3.bf16.msra.mxu1 %v1491_v24 }
  0x77   :  { %1308 = vmatprep.subr.bf16.mxu1 %v1492_v25  ;;  %1381 = vmatpush3.bf16.msra.mxu0 %v1497_v31  ;;  %v1516_v25 = vld [vmem:[#allocation6 + $0x30] sm:$0xff]   ;;  %v1521_v31 = vld [vmem:[#allocation7 + $0x18] sm:$0xff]  }
  0x78   :  { %1382 = vmatprep.subr.bf16.mxu0 %v1692_v28 }
  0x7a   :  { %1309 = vmatpush3.bf16.msra.mxu1 %v1493_v26  ;;  %v1517_v26 = vld [vmem:[#allocation6 + $0x38] sm:$0xff]  }
  0x7b   :  { %1394 = vmatprep.subr.bf16.mxu1 %v1692_v28  ;;  %1383 = vmatpush3.bf16.msra.mxu0 %v1498_v32  ;;  %v1522_v32 = vld [vmem:[#allocation7 + $0x20] sm:$0xff]  }
  0x7c   :  { %1384 = vmatprep.subr.bf16.mxu0 %v1692_v28 }
  0x7f   :  { %1385 = vmatpush3.bf16.msra.mxu0 %v1499_v52  ;;  %v1534_v52 = vld [vmem:[#allocation9 + $0x24] ss:$8 sps:$4 sm:$0xff]  }
  0x80   :  { %1386 = vmatprep.subr.bf16.mxu0 %v1692_v28 }
  0x83   :  { %1387 = vmatpush3.bf16.msra.mxu0 %v1500_v53  ;;  %v1532_v53 = vld [vmem:[#allocation9 + $0x20] ss:$8 sps:$4 sm:$0xff]  }
  0x84   :  { %1388 = vmatprep.subr.bf16.mxu0 %v1692_v28 }
  0x87   :  { %1389 = vmatpush3.bf16.msra.mxu0 %v1501_v54  ;;  %v1537_v54 = vld [vmem:[#allocation9 + $0x34] ss:$8 sps:$4 sm:$0xff]  }
  0x88   :  { %1414 = vmatprep.subr.bf16.mxu0 %v1692_v28 }
 0x13d   :  { %v204_v40 = vpop.f32.mrb[0].mxu0 }
 0x13e   :  { %v205_v41 = vadd.f32 %v204_v40, %v119_v38  ;;  %v206_v42 = vpop.f32.mrb[1].mxu0 }
 0x13f   :  { %v207_v43 = vadd.f32 %v206_v42, %v123_v39  ;;  %v208_v44 = vpop.f32.mrb[2].mxu0 }
 0x140   :  { %vm211_vm1 = vcmp.ge.f32.partialorder %v205_v41, 0.0  ;;  %v213_v45 = vmul.f32 0.01, %v205_v41  ;;  %v209_v46 = vpop.f32.mrb[3].mxu0 }
 0x141   :  { %vm212_vm2 = vcmp.ge.f32.partialorder %v207_v43, 0.0  ;;  %v214_v47 = vmul.f32 0.01, %v207_v43  ;;  %v1524_v46 = vld [vmem:[#allocation7 + $0x30] sm:$0xff]  }
 0x142   :  { %v215_v48 = vsel %vm211_vm1, %v205_v41, %v213_v45 }
 0x143   :  { %v216_v49 = vsel %vm212_vm2, %v207_v43, %v214_v47  ;;  %v217_v51 = vpack.c.bf16 %v215_v48, %v215_v48  ;;  %v1525_v47 = vld [vmem:[#allocation7 + $0x38] sm:$0xff]   ;;  %v1526_v48 = vld [vmem:[#allocation9] ss:$8 sps:$4 sm:$0xff]  }
 0x144   :  { %v218_v50 = vpack.c.bf16 %v216_v49, %v216_v49  ;;  %v1528_v49 = vld [vmem:[#allocation9 + $0x4] ss:$8 sps:$4 sm:$0xff]  }
 0x146   :  { %386 = vmatprep.mubr.bf16.mxu1 %v218_v50  ;;  %v1531_v50 = vld [vmem:[#allocation9 + $0x14] ss:$8 sps:$4 sm:$0xff]  }
 0x147   :  { %387 = vmatmul.mubr.bf16.vlgmr.msra.gmra.mrb[0].mxu1 %v217_v51  ;;  %v1529_v51 = vld [vmem:[#allocation9 + $0x10] ss:$8 sps:$4 sm:$0xff]  }
 0x148   :  { %1410 = vmatprep.mubr.msk.bf16.mxu1 %vm1693_vm3, %v1692_v28  ;;  %1395 = vmatpush3.bf16.msra.mxu1 %v1502_v55  ;;  %v1540_v55 = vld [vmem:[#allocation9 + $0x44] ss:$8 sps:$4 sm:$0xff]  }
 0x149   :  { %1396 = vmatprep.subr.bf16.mxu1 %v1692_v28 }
 0x14c   :  { %1397 = vmatpush3.bf16.msra.mxu1 %v1503_v56  ;;  %v1543_v56 = vld [vmem:[#allocation9 + $0x54] ss:$8 sps:$4 sm:$0xff]  }
 0x14d   :  { %1398 = vmatprep.subr.bf16.mxu1 %v1692_v28 }
 0x150   :  { %1399 = vmatpush3.bf16.msra.mxu1 %v1504_v57  ;;  %v1541_v57 = vld [vmem:[#allocation9 + $0x50] ss:$8 sps:$4 sm:$0xff]  }
 0x151   :  { %1400 = vmatprep.subr.bf16.mxu1 %v1692_v28 }
 0x154   :  { %1401 = vmatpush3.bf16.msra.mxu1 %v1505_v58  ;;  %v1243_v58 = vld [vmem:[%s2050_s9 + $0x5] ss:$0 sm:$0xff] }
 0x155   :  { %1402 = vmatprep.subr.bf16.mxu1 %v1692_v28 }
 0x158   :  { %1403 = vmatpush3.bf16.msra.mxu1 %v1506_v59 }
 0x159   :  { %1404 = vmatprep.subr.bf16.mxu1 %v1692_v28 }
 0x15c   :  { %1405 = vmatpush3.bf16.msra.mxu1 %v1507_v60 }
 0x15d   :  { %1406 = vmatprep.subr.bf16.mxu1 %v1692_v28 }
 0x160   :  { %1407 = vmatpush3.bf16.msra.mxu1 %v1508_v8  ;;  %v1550_v8 = vld [vmem:[%s2049_s8 + $0x40] sm:$0xff]  }
 0x161   :  { %1408 = vmatprep.subr.bf16.mxu1 %v1692_v28 }
 0x164   :  { %1409 = vmatpush3.bf16.msra.mxu1 %v1509_v9  ;;  %v1551_v9 = vld [vmem:[%s2049_s8] sm:$0xff]  }
 0x165   :  { %1434 = vmatprep.subr.bf16.mxu1 %v1692_v28 }
 0x21a   :  { %v1310_v61 = vpop.f32.mrb[0].mxu1 }
 0x21b   :  { %v1311_v63 = vpop.f32.mrb[1].mxu1 }
 0x21c   :  { %v1312_v1 = vadd.f32 %v1311_v63, %v1310_v61  ;;  %v1313_v2 = vpop.f32.mrb[2].mxu1 }
 0x21d   :  { %v1314_v3 = vpop.f32.mrb[3].mxu1 }
 0x21e   :  { %v389_v4 = vadd.f32 %v1312_v1, %v1208_v62 }
 0x220   :  { %vm394_vm4 = vcmp.ge.f32.partialorder %v389_v4, 0.0  ;;  %v395_v5 = vmul.f32 0.01, %v389_v4 }
 0x222   :  { %v396_v6 = vsel %vm394_vm4, %v389_v4, %v395_v5  ;;  %v1546_v4 = vld [vmem:[#allocation9 + $0x64] ss:$8 sps:$4 sm:$0xff]   ;;  %v1544_v5 = vld [vmem:[#allocation9 + $0x60] ss:$8 sps:$4 sm:$0xff]  }
 0x223   :  { %v397_v7 = vpack.c.bf16 %v396_v6, %v396_v6  ;;  %v1549_v6 = vld [vmem:[#allocation9 + $0x74] ss:$8 sps:$4 sm:$0xff]  }
 0x225   :  { %1391 = vmatmul.mubr.bf16.vlgmr.msra.gmra.mrb[4].mxu0 %v397_v7  ;;  %v1547_v7 = vld [vmem:[#allocation9 + $0x70] ss:$8 sps:$4 sm:$0xff]  }
 0x226   :  { %1430 = vmatprep.mubr.msk.bf16.mxu0 %vm1693_vm3, %v1692_v28  ;;  %1415 = vmatpush3.bf16.msra.mxu0 %v1510_v10  ;;  %v1552_v10 = vld [vmem:[%s2049_s8 + $0x48] sm:$0xff]  }
 0x227   :  { %1416 = vmatprep.subr.bf16.mxu0 %v1692_v28 }
 0x22a   :  { %1417 = vmatpush3.bf16.msra.mxu0 %v1511_v11  ;;  %v1553_v11 = vld [vmem:[%s2049_s8 + $0x8] sm:$0xff]  }
 0x22b   :  { %1418 = vmatprep.subr.bf16.mxu0 %v1692_v28 }
 0x22e   :  { %1419 = vmatpush3.bf16.msra.mxu0 %v1512_v12  ;;  %v1554_v12 = vld [vmem:[%s2049_s8 + $0x50] sm:$0xff]  }
 0x22f   :  { %1420 = vmatprep.subr.bf16.mxu0 %v1692_v28 }
 0x232   :  { %1421 = vmatpush3.bf16.msra.mxu0 %v1513_v13  ;;  %v1555_v13 = vld [vmem:[%s2049_s8 + $0x10] sm:$0xff]  }
 0x233   :  { %1422 = vmatprep.subr.bf16.mxu0 %v1692_v28 }
 0x236   :  { %1423 = vmatpush3.bf16.msra.mxu0 %v1514_v14  ;;  %v1556_v14 = vld [vmem:[%s2049_s8 + $0x58] sm:$0xff]  }
 0x237   :  { %1424 = vmatprep.subr.bf16.mxu0 %v1692_v28 }
 0x23a   :  { %1425 = vmatpush3.bf16.msra.mxu0 %v1515_v15  ;;  %v1557_v15 = vld [vmem:[%s2049_s8 + $0x18] sm:$0xff]  }
 0x23b   :  { %1426 = vmatprep.subr.bf16.mxu0 %v1692_v28 }
 0x23e   :  { %1427 = vmatpush3.bf16.msra.mxu0 %v1516_v25 }
 0x23f   :  { %1428 = vmatprep.subr.bf16.mxu0 %v1692_v28 }
 0x242   :  { %1429 = vmatpush3.bf16.msra.mxu0 %v1517_v26 }
 0x243   :  { %966 = vmatprep.subr.bf16.mxu0 %v1528_v49 }
 0x2f8   :  { %v503_v17 = vpop.f32.mrb[4].mxu0 }
 0x2f9   :  { %v504_v18 = vadd.f32 %v1225_v16, %v503_v17  ;;  %v1392_v19 = vpop.f32.mrb[5].mxu0  ;;  %v1558_v16 = vld [vmem:[%s2049_s8 + $0x60] sm:$0xff]  }
 0x2fa   :  { %v506_v20 = vpop.f32.mrb[6].mxu0  ;;  %v1559_v17 = vld [vmem:[%s2049_s8 + $0x20] sm:$0xff]   ;;  %v1561_v19 = vld [vmem:[%s2049_s8 + $0x28] sm:$0xff]  }
 0x2fb   :  { %vm509_vm5 = vcmp.ge.f32.partialorder %v504_v18, 0.0  ;;  %v510_v21 = vmul.f32 0.01, %v504_v18  ;;  %v1393_v22 = vpop.f32.mrb[7].mxu0  ;;  %v1252_v20 = vld [vmem:[%s2050_s9 + $0x6] ss:$0 sm:$0xff] }
 0x2fd   :  { %v511_v23 = vsel %vm509_vm5, %v504_v18, %v510_v21  ;;  %v1560_v18 = vld [vmem:[%s2049_s8 + $0x68] sm:$0xff]  }
 0x2fe   :  { %v512_v24 = vpack.c.bf16 %v511_v23, %v511_v23 }
 0x300   :  { %1411 = vmatmul.mubr.bf16.vlgmr.msra.gmra.mrb[4].mxu1 %v512_v24 }
 0x301   :  { %1450 = vmatprep.mubr.msk.bf16.mxu1 %vm1693_vm3, %v1692_v28  ;;  %1435 = vmatpush3.bf16.msra.mxu1 %v1518_v27 }
 0x302   :  { %1436 = vmatprep.subr.bf16.mxu1 %v1692_v28 }
 0x305   :  { %1437 = vmatpush3.bf16.msra.mxu1 %v1519_v29 }
 0x306   :  { %1438 = vmatprep.subr.bf16.mxu1 %v1692_v28 }
 0x309   :  { %1439 = vmatpush3.bf16.msra.mxu1 %v1520_v30  ;;  %v1562_v30 = vld [vmem:[%s2049_s8 + $0x70] sm:$0xff]  }
 0x30a   :  { %1440 = vmatprep.subr.bf16.mxu1 %v1692_v28 }
 0x30d   :  { %1441 = vmatpush3.bf16.msra.mxu1 %v1521_v31  ;;  %v1563_v31 = vld [vmem:[%s2049_s8 + $0x30] sm:$0xff]  }
 0x30e   :  { %1442 = vmatprep.subr.bf16.mxu1 %v1692_v28 }
 0x311   :  { %1443 = vmatpush3.bf16.msra.mxu1 %v1522_v32  ;;  %v1564_v32 = vld [vmem:[%s2049_s8 + $0x78] sm:$0xff]  }
 0x312   :  { %1444 = vmatprep.subr.bf16.mxu1 %v1692_v28 }
 0x315   :  { %1445 = vmatpush3.bf16.msra.mxu1 %v1523_v33  ;;  %v1565_v33 = vld [vmem:[%s2049_s8 + $0x38] sm:$0xff]  }
 0x316   :  { %1446 = vmatprep.subr.bf16.mxu1 %v1692_v28 }
 0x319   :  { %1447 = vmatpush3.bf16.msra.mxu1 %v1524_v46 }
 0x31a   :  { %1448 = vmatprep.subr.bf16.mxu1 %v1692_v28  ;;  %v1538_v28 = vld [vmem:[#allocation9 + $0x40] ss:$8 sps:$4 sm:$0xff]  }
 0x31d   :  { %1449 = vmatpush3.bf16.msra.mxu1 %v1525_v47 }
 0x31e   :  { %1352 = vmatprep.subr.bf16.mxu1 %v1550_v8 }
 0x3d3   :  { %v618_v38 = vpop.f32.mrb[4].mxu1 }
 0x3d4   :  { %v619_v39 = vadd.f32 %v1234_v36, %v618_v38  ;;  %v1412_v40 = vpop.f32.mrb[5].mxu1  ;;  %v874_v36 = vld [vmem:[%s2050_s9 + $0x7] sm:$0x3] }
 0x3d5   :  { %v621_v41 = vpop.f32.mrb[6].mxu1  ;;  %v879_v38 = vrot.slane %v874_v36, %v118_v35 }
 0x3d6   :  { %vm624_vm6 = vcmp.ge.f32.partialorder %v619_v39, 0.0  ;;  %v625_v42 = vmul.f32 0.01, %v619_v39  ;;  %v1413_v43 = vpop.f32.mrb[7].mxu1 }
 0x3d8   :  { %v626_v44 = vsel %vm624_vm6, %v619_v39, %v625_v42  ;;  %v883_v39 = vrot.slane %v874_v36, %v122_v37 }
 0x3d9   :  { %v627_v45 = vpack.c.bf16 %v626_v44, %v626_v44 }
 0x3db   :  { %1431 = vmatmul.mubr.bf16.vlgmr.msra.gmra.mrb[8].mxu0 %v627_v45 }
 0x3dc   :  { %998 = vmatprep.mubr.bf16.mxu0 %v1691_v0  ;;  %967 = vmatpush1.bf16.msra.mxu0 %v1526_v48  ;;  %v1535_v0 = vld [vmem:[#allocation9 + $0x30] ss:$8 sps:$4 sm:$0xff]  }
 0x3dd   :  { %968 = vmatprep.subr.bf16.mxu0 %v1531_v50 }
 0x3e0   :  { %969 = vmatpush1.bf16.msra.mxu0 %v1529_v51 }
 0x3e1   :  { %970 = vmatprep.subr.bf16.mxu0 %v1534_v52 }
 0x3e4   :  { %971 = vmatpush1.bf16.msra.mxu0 %v1532_v53 }
 0x3e5   :  { %972 = vmatprep.subr.bf16.mxu0 %v1537_v54 }
 0x3e8   :  { %973 = vmatpush1.bf16.msra.mxu0 %v1535_v0 }
 0x3e9   :  { %974 = vmatprep.subr.bf16.mxu0 %v1540_v55 }
 0x3ec   :  { %975 = vmatpush1.bf16.msra.mxu0 %v1538_v28 }
 0x3ed   :  { %976 = vmatprep.subr.bf16.mxu0 %v1543_v56 }
 0x3f0   :  { %977 = vmatpush1.bf16.msra.mxu0 %v1541_v57 }
 0x3f1   :  { %978 = vmatprep.subr.bf16.mxu0 %v1546_v4 }
 0x3f4   :  { %979 = vmatpush1.bf16.msra.mxu0 %v1544_v5 }
 0x3f5   :  { %980 = vmatprep.subr.bf16.mxu0 %v1549_v6 }
 0x3f8   :  { %981 = vmatpush1.bf16.msra.mxu0 %v1547_v7 }
 0x4ae   :  { %v733_v59 = vpop.f32.mrb[8].mxu0 }
 0x4af   :  { %v734_v60 = vadd.f32 %v1243_v58, %v733_v59  ;;  %v1432_v61 = vpop.f32.mrb[9].mxu0 }
 0x4b0   :  { %v736_v62 = vpop.f32.mrb[10].mxu0 }
 0x4b1   :  { %vm739_vm7 = vcmp.ge.f32.partialorder %v734_v60, 0.0  ;;  %v740_v63 = vmul.f32 0.01, %v734_v60  ;;  %v1433_v1 = vpop.f32.mrb[11].mxu0 }
 0x4b3   :  { %v741_v2 = vsel %vm739_vm7, %v734_v60, %v740_v63 }
 0x4b4   :  { %v742_v3 = vpack.c.bf16 %v741_v2, %v741_v2 }
 0x4b6   :  { %1451 = vmatmul.mubr.bf16.vlgmr.msra.gmra.mrb[8].mxu1 %v742_v3 }
 0x4b7   :  { %1353 = vmatpush3.bf16.msra.mxu1 %v1551_v9 }
 0x4b8   :  { %1354 = vmatprep.subr.bf16.mxu1 %v1552_v10 }
 0x4bb   :  { %1355 = vmatpush3.bf16.msra.mxu1 %v1553_v11 }
 0x4bc   :  { %1356 = vmatprep.subr.bf16.mxu1 %v1554_v12 }
 0x4bf   :  { %1357 = vmatpush3.bf16.msra.mxu1 %v1555_v13 }
 0x4c0   :  { %1358 = vmatprep.subr.bf16.mxu1 %v1556_v14 }
 0x4c3   :  { %1359 = vmatpush3.bf16.msra.mxu1 %v1557_v15 }
 0x4c4   :  { %1360 = vmatprep.subr.bf16.mxu1 %v1558_v16 }
 0x4c7   :  { %1361 = vmatpush3.bf16.msra.mxu1 %v1559_v17 }
 0x4c8   :  { %1362 = vmatprep.subr.bf16.mxu1 %v1560_v18 }
 0x4cb   :  { %1363 = vmatpush3.bf16.msra.mxu1 %v1561_v19 }
 0x4cc   :  { %1364 = vmatprep.subr.bf16.mxu1 %v1562_v30 }
 0x4cf   :  { %1365 = vmatpush3.bf16.msra.mxu1 %v1563_v31 }
 0x4d0   :  { %1366 = vmatprep.subr.bf16.mxu1 %v1564_v32 }
 0x4d3   :  { %1367 = vmatpush3.bf16.msra.mxu1 %v1565_v33 }
 0x589   :  { %v848_v21 = vpop.f32.mrb[8].mxu1 }
 0x58a   :  { %v849_v22 = vadd.f32 %v1252_v20, %v848_v21  ;;  %v1452_v23 = vpop.f32.mrb[9].mxu1 }
 0x58b   :  { %v851_v24 = vpop.f32.mrb[10].mxu1 }
 0x58c   :  { %vm854_vm8 = vcmp.ge.f32.partialorder %v849_v22, 0.0  ;;  %v855_v25 = vmul.f32 0.01, %v849_v22  ;;  %v1453_v26 = vpop.f32.mrb[11].mxu1 }
 0x58e   :  { %v856_v27 = vsel %vm854_vm8, %v849_v22, %v855_v25 }
 0x58f   :  { %v857_v29 = vpack.c.bf16 %v856_v27, %v856_v27 }
 0x591   :  { %999 = vmatmul.mubr.bf16.vlgmr.msra.gmra.mrb[12].mxu0 %v857_v29 }
 0x664   :  { %v1000_v40 = vpop.f32.mrb[12].mxu0 }
 0x665   :  { %v1001_v41 = vadd.f32 %v1000_v40, %v879_v38  ;;  %v1002_v42 = vpop.f32.mrb[13].mxu0 }
 0x666   :  { %v1003_v43 = vadd.f32 %v1002_v42, %v883_v39  ;;  %v1004_v44 = vpop.f32.mrb[14].mxu0 }
 0x667   :  { %vm1007_vm9 = vcmp.ge.f32.partialorder %v1001_v41, 0.0  ;;  %v1009_v45 = vmul.f32 0.01, %v1001_v41  ;;  %v1005_v46 = vpop.f32.mrb[15].mxu0 }
 0x668   :  { %vm1008_vm10 = vcmp.ge.f32.partialorder %v1003_v43, 0.0  ;;  %v1010_v47 = vmul.f32 0.01, %v1003_v43 }
 0x669   :  { %v1011_v48 = vsel %vm1007_vm9, %v1001_v41, %v1009_v45 }
 0x66a   :  { %v1012_v49 = vsel %vm1008_vm10, %v1003_v43, %v1010_v47  ;;  %v1013_v51 = vpack.c.bf16 %v1011_v48, %v1011_v48 }
 0x66b   :  { %v1014_v50 = vpack.c.bf16 %v1012_v49, %v1012_v49 }
 0x66d   :  { %1182 = vmatprep.mubr.bf16.mxu1 %v1014_v50 }
 0x66e   :  { %1183 = vmatmul.mubr.bf16.vlgmr.msra.gmra.mrb[12].mxu1 %v1013_v51 }
 0x741   :  { %v1368_v35 = vpop.f32.mrb[12].mxu1 }
 0x742   :  { %v1369_v37 = vpop.f32.mrb[13].mxu1 }
 0x743   :  { %v1370_v52 = vadd.f32 %v1369_v37, %v1368_v35  ;;  %v1371_v53 = vpop.f32.mrb[14].mxu1 }
 0x744   :  { %v1372_v54 = vpop.f32.mrb[15].mxu1 }
 0x745   :  { %v1185_v0 = vadd.f32 %v1370_v52, %v1277_v34 }
 0x747   :  { %v1190_v55 = vmax.f32 %v1185_v0, 0.0 }
 0x749   :  { %1191 = vst.msk [vmem:[%s2051_s10] sm:$0xff] %vm166_vm0, %v1190_v55 }
 0x74a   :  { %1196 = vsyncpa [#allocation3], 1 }
 0x74b   :  { %1197 = vsyncpa [#allocation5], 1 }
 0x74c   :  { %1198 = vsyncpa [#allocation8], 1 }

</bundles_post_ra>
